<compile_context>
chip_gen: v5e
topology: v5e:2x2
jax: 0.10.0
libtpu: 0.0.40
codegen_flags: <defaults>
</compile_context>

<pallas_src>
import jax
import jax.numpy as jnp
from jax.experimental import pallas as pl
from jax.experimental.pallas import tpu as pltpu

_LANE = 128
_SUBLANE = 8


def _round_up(n, m):
    return ((n + m - 1) // m) * m


def _mlp_kernel(x_ref, w1_ref, b1_ref, w2_ref, b2_ref, o_ref):
    # fc1: (TB, in_p) @ (in_p, hid_p) -> f32 accumulate on MXU (bf16 operands)
    x_bf = x_ref[...].astype(jnp.bfloat16)
    h = jnp.dot(x_bf, w1_ref[...], preferred_element_type=jnp.float32)
    # bias + ReLU epilogue in f32 (VPU)
    h = jnp.maximum(h + b1_ref[...], 0.0)
    # fc2: (TB, hid_p) @ (hid_p, out_p) -> f32 accumulate
    y = jnp.dot(h.astype(jnp.bfloat16), w2_ref[...],
                preferred_element_type=jnp.float32)
    y = y + b2_ref[...]
    o_ref[...] = y.astype(o_ref.dtype)


def feedforward_mlp(x, w1, b1, w2, b2, *, block_batch=512):
    """Fused 2-layer MLP forward. x: (B, inputDim); returns (B, outputDim)."""
    B, in_dim = x.shape
    hid_dim = w1.shape[1]
    out_dim = w2.shape[1]
    b1 = b1.reshape(1, -1)
    b2 = b2.reshape(1, -1)

    # Lane-dense, 128-aligned feature dims; 8-aligned batch tile.
    in_p = _round_up(in_dim, _LANE)
    hid_p = _round_up(hid_dim, _LANE)
    out_p = _round_up(out_dim, _LANE)
    TB = min(block_batch, _round_up(B, _SUBLANE))
    B_p = _round_up(B, TB)

    # Zero-pad operands (weights cast to bf16 once here -> half the weight DMA bytes).
    xp = jnp.zeros((B_p, in_p), x.dtype).at[:B, :in_dim].set(x)
    w1p = jnp.zeros((in_p, hid_p), jnp.bfloat16).at[:in_dim, :hid_dim].set(
        w1.astype(jnp.bfloat16))
    b1p = jnp.zeros((1, hid_p), jnp.float32).at[:, :hid_dim].set(
        b1.astype(jnp.float32))
    w2p = jnp.zeros((hid_p, out_p), jnp.bfloat16).at[:hid_dim, :out_dim].set(
        w2.astype(jnp.bfloat16))
    b2p = jnp.zeros((1, out_p), jnp.float32).at[:, :out_dim].set(
        b2.astype(jnp.float32))

    # VMEM budget: double-buffered x/out tiles + single-resident weights/biases,
    # with 4x headroom for compiler scratch, clamped to v7x's 64 MiB ceiling.
    budget = (2 * TB * in_p * xp.dtype.itemsize
              + 2 * TB * out_p * x.dtype.itemsize
              + w1p.size * 2 + w2p.size * 2
              + b1p.size * 4 + b2p.size * 4)
    vmem_limit = int(min(max(4 * budget, 16 << 20), 64 << 20))

    out_padded = pl.pallas_call(
        _mlp_kernel,
        out_shape=jax.ShapeDtypeStruct((B_p, out_p), x.dtype),
        grid_spec=pltpu.PrefetchScalarGridSpec(
            num_scalar_prefetch=0,
            grid=(B_p // TB,),
            in_specs=[
                pl.BlockSpec((TB, in_p), lambda i: (i, 0)),      # x tile streams
                pl.BlockSpec((in_p, hid_p), lambda i: (0, 0)),   # w1 resident
                pl.BlockSpec((1, hid_p), lambda i: (0, 0)),      # b1 resident
                pl.BlockSpec((hid_p, out_p), lambda i: (0, 0)),  # w2 resident
                pl.BlockSpec((1, out_p), lambda i: (0, 0)),      # b2 resident
            ],
            out_specs=pl.BlockSpec((TB, out_p), lambda i: (i, 0)),
        ),
        compiler_params=pltpu.CompilerParams(
            dimension_semantics=("parallel",),   # megacore sharding on v7x
            vmem_limit_bytes=vmem_limit,
        ),
    )(xp, w1p, b1p, w2p, b2p)

    return out_padded[:B, :out_dim]
    # TODO(synk): if hidden_dim ever grows past VMEM residency, add a K grid
    # axis for the fc1 contraction with a pl.when-initialized f32 accumulator.


def init_params(key, input_dim, hidden_dim, output_dim, dtype=jnp.float32):
    """Deterministic PyTorch-style (uniform +/- 1/sqrt(fan_in)) initialization."""
    k1, k2, k3, k4 = jax.random.split(key, 4)
    lim1 = 1.0 / jnp.sqrt(jnp.array(input_dim, dtype))
    lim2 = 1.0 / jnp.sqrt(jnp.array(hidden_dim, dtype))
    # stored as (in, out) -- transposed relative to nn.Linear's (out, in)
    w1 = jax.random.uniform(k1, (input_dim, hidden_dim), dtype, -lim1, lim1)
    b1 = jax.random.uniform(k2, (1, hidden_dim), dtype, -lim1, lim1)
    w2 = jax.random.uniform(k3, (hidden_dim, output_dim), dtype, -lim2, lim2)
    b2 = jax.random.uniform(k4, (1, output_dim), dtype, -lim2, lim2)
    return w1, b1, w2, b2


if __name__ == "__main__":
    input_dim, hidden_dim, output_dim = 16, 32, 8
    batch = 8

    key = jax.random.PRNGKey(0)
    kx, kp = jax.random.split(key)
    x = jax.random.normal(kx, (batch, input_dim), jnp.float32)
    w1, b1, w2, b2 = init_params(kp, input_dim, hidden_dim, output_dim)

    y = feedforward_mlp(x, w1, b1, w2, b2)
    y = jax.block_until_ready(y)
    assert y.shape == (batch, output_dim)

    # Reference with identical math (bf16 matmul operands, f32 accumulation).
    w1b = w1.astype(jnp.bfloat16)
    w2b = w2.astype(jnp.bfloat16)
    h_ref = jnp.maximum(
        jnp.dot(x.astype(jnp.bfloat16), w1b, preferred_element_type=jnp.float32)
        + b1, 0.0)
    ref = jnp.dot(h_ref.astype(jnp.bfloat16), w2b,
                  preferred_element_type=jnp.float32) + b2
    assert jnp.allclose(y, ref, atol=1e-3, rtol=1e-3)

    # Sanity check against full-f32 math (loose tolerance for bf16 rounding).
    ref_f32 = jnp.maximum(x @ w1 + b1, 0.0) @ w2 + b2
    assert jnp.allclose(y, ref_f32, atol=5e-2, rtol=5e-2)

    print("KERNEL_OK")
</pallas_src>

<mosaic_0001>
module attributes {stable_mosaic.version = 11 : i64} {
  func.func @_mlp_kernel(%arg0: i32, %arg1: memref<8x128xf32, #tpu.memory_space<vmem>>, %arg2: memref<128x128xbf16, #tpu.memory_space<vmem>>, %arg3: memref<1x128xf32, #tpu.memory_space<vmem>>, %arg4: memref<128x128xbf16, #tpu.memory_space<vmem>>, %arg5: memref<1x128xf32, #tpu.memory_space<vmem>>, %arg6: memref<8x128xf32, #tpu.memory_space<vmem>>) attributes {dimension_semantics = [#tpu.dimension_semantics<parallel>], iteration_bounds = array<i64: 1>, scalar_prefetch = 0 : i64, scratch_operands = 0 : i64, tpu.core_type = #tpu.core_type<tc>, window_params = [{transform_indices = @transform_0, window_bounds = array<i64: 8, 128>}, {pipeline_mode = #tpu.pipeline_mode<synchronous>, transform_indices = @transform_1, window_bounds = array<i64: 128, 128>}, {pipeline_mode = #tpu.pipeline_mode<synchronous>, transform_indices = @transform_2, window_bounds = array<i64: 1, 128>}, {pipeline_mode = #tpu.pipeline_mode<synchronous>, transform_indices = @transform_3, window_bounds = array<i64: 128, 128>}, {pipeline_mode = #tpu.pipeline_mode<synchronous>, transform_indices = @transform_4, window_bounds = array<i64: 1, 128>}, {transform_indices = @transform_5, window_bounds = array<i64: 8, 128>}]} {
    %c0 = arith.constant 0 : index
    %c0_0 = arith.constant 0 : index
    %0 = vector.load %arg1[%c0, %c0_0] : memref<8x128xf32, #tpu.memory_space<vmem>>, vector<8x128xf32>
    %1 = arith.truncf %0 : vector<8x128xf32> to vector<8x128xbf16>
    %c0_1 = arith.constant 0 : index
    %c0_2 = arith.constant 0 : index
    %2 = vector.load %arg2[%c0_1, %c0_2] : memref<128x128xbf16, #tpu.memory_space<vmem>>, vector<128x128xbf16>
    %cst = arith.constant dense<0.000000e+00> : vector<8x128xf32>
    %3 = tpu.matmul %1, %2, %cst {dimension_numbers = #tpu.dot_dimension_numbers<[1], [0], [0], [1], [0, 0, 1, 1], [], []>} : vector<8x128xbf16>, vector<128x128xbf16>, vector<8x128xf32> -> vector<8x128xf32>
    %c0_3 = arith.constant 0 : index
    %c0_4 = arith.constant 0 : index
    %4 = vector.load %arg3[%c0_3, %c0_4] : memref<1x128xf32, #tpu.memory_space<vmem>>, vector<1x128xf32>
    %5 = vector.broadcast %4 : vector<1x128xf32> to vector<8x128xf32>
    %6 = arith.addf %3, %5 : vector<8x128xf32>
    %cst_5 = arith.constant 0.000000e+00 : f32
    %7 = vector.broadcast %cst_5 : f32 to vector<8x128xf32>
    %8 = arith.maximumf %6, %7 : vector<8x128xf32>
    %9 = arith.truncf %8 : vector<8x128xf32> to vector<8x128xbf16>
    %c0_6 = arith.constant 0 : index
    %c0_7 = arith.constant 0 : index
    %10 = vector.load %arg4[%c0_6, %c0_7] : memref<128x128xbf16, #tpu.memory_space<vmem>>, vector<128x128xbf16>
    %cst_8 = arith.constant dense<0.000000e+00> : vector<8x128xf32>
    %11 = tpu.matmul %9, %10, %cst_8 {dimension_numbers = #tpu.dot_dimension_numbers<[1], [0], [0], [1], [0, 0, 1, 1], [], []>} : vector<8x128xbf16>, vector<128x128xbf16>, vector<8x128xf32> -> vector<8x128xf32>
    %c0_9 = arith.constant 0 : index
    %c0_10 = arith.constant 0 : index
    %12 = vector.load %arg5[%c0_9, %c0_10] : memref<1x128xf32, #tpu.memory_space<vmem>>, vector<1x128xf32>
    %13 = vector.broadcast %12 : vector<1x128xf32> to vector<8x128xf32>
    %14 = arith.addf %11, %13 : vector<8x128xf32>
    %c0_11 = arith.constant 0 : index
    %c0_12 = arith.constant 0 : index
    %15 = vector.load %arg6[%c0_11, %c0_12] : memref<8x128xf32, #tpu.memory_space<vmem>>, vector<8x128xf32>
    tpu.vector_store %arg6[%c0_11, %c0_12], %14 {strides = array<i32>} : memref<8x128xf32, #tpu.memory_space<vmem>>, vector<8x128xf32>,
    return
  }
  func.func @transform_0(%arg0: i32) -> (i32, i32) {
    %c0_i32 = arith.constant 0 : i32
    %c0_i32_0 = arith.constant 0 : i32
    return %arg0, %c0_i32 : i32, i32
  }
  func.func @transform_1(%arg0: i32) -> (i32, i32) {
    %c0_i32 = arith.constant 0 : i32
    %c0_i32_0 = arith.constant 0 : i32
    %c0_i32_1 = arith.constant 0 : i32
    return %c0_i32, %c0_i32_0 : i32, i32
  }
  func.func @transform_2(%arg0: i32) -> (i32, i32) {
    %c0_i32 = arith.constant 0 : i32
    %c0_i32_0 = arith.constant 0 : i32
    %c0_i32_1 = arith.constant 0 : i32
    return %c0_i32, %c0_i32_0 : i32, i32
  }
  func.func @transform_3(%arg0: i32) -> (i32, i32) {
    %c0_i32 = arith.constant 0 : i32
    %c0_i32_0 = arith.constant 0 : i32
    %c0_i32_1 = arith.constant 0 : i32
    return %c0_i32, %c0_i32_0 : i32, i32
  }
  func.func @transform_4(%arg0: i32) -> (i32, i32) {
    %c0_i32 = arith.constant 0 : i32
    %c0_i32_0 = arith.constant 0 : i32
    %c0_i32_1 = arith.constant 0 : i32
    return %c0_i32, %c0_i32_0 : i32, i32
  }
  func.func @transform_5(%arg0: i32) -> (i32, i32) {
    %c0_i32 = arith.constant 0 : i32
    %c0_i32_0 = arith.constant 0 : i32
    return %arg0, %c0_i32 : i32, i32
  }
}

</mosaic_0001>

<bundles_post_ra>
// kernel: tpu_custom_call.1
= control target key start
LH: loop header
LB: loop body
LE: loop exit
PB: predicated region body
PF: predicated region fallthrough
CT: control target
= control target key end

     0   :  { %10 = vsyncpa [#allocation3], 0  ;;  %s495_s0 = inlined_call_operand.hbm [shape: f32[8,128], index: 0, kind: input, shape index: {}]   ;;  %s496_s1 = inlined_call_operand.hbm [shape: bf16[128,128], index: 1, kind: input, shape index: {}]   ;;  %s497_s2 = inlined_call_operand.vmem [shape: f32[1,128], index: 2, kind: input, shape index: {}]   ;;  %s498_s3 = inlined_call_operand.hbm [shape: bf16[128,128], index: 3, kind: input, shape index: {}]   ;;  %s499_s4 = inlined_call_operand.vmem [shape: f32[1,128], index: 4, kind: input, shape index: {}]   ;;  %s500_s5 = inlined_call_operand.hbm [shape: f32[8,128], index: 5, kind: output, shape index: {}]  }
   0x1   :  { %11 = vsyncpa [#allocation6], 0  ;;  %s28_s20 = sshll.u32 %s496_s1, 4  ;;  %s29_s20 = int_to_ptr.hbm [resolvable:$true] %s28_s20 }
   0x2   :  { %12 = vsyncpa [#allocation4], 0  ;;  %s441_s21 = smov [#allocation5]   ;;  %s18_s25 = sshll.u32 %s495_s0, 4  ;;  %s19_s25 = int_to_ptr.hbm [resolvable:$true] %s18_s25 }
   0x3   :  { %s30_s22 = sshll.u32 %s441_s21, 4  ;;  %s442_s26 = smov 64   ;;  %s31_s22 = int_to_ptr.vmem [resolvable:$true] %s30_s22 }
   0x4   :  { %s443_s27 = smov 4   ;;  %s444_s28 = smov [#allocation2]  }
   0x5   :  { %36 = dma.hbm_to_vmem [thread:$0]  %s29_s20, 1024, %s31_s22, [#allocation6], %s442_s26, %s442_s26, %s443_s27  }
   0x6   :  { %s20_s29 = sshll.u32 %s444_s28, 4  ;;  %s43_s7 = sshll.u32 %s498_s3, 4  ;;  %s21_s29 = int_to_ptr.vmem [resolvable:$true] %s20_s29  ;;  %s44_s7 = int_to_ptr.hbm [resolvable:$true] %s43_s7 }
   0x7   :  { %23 = dma.hbm_to_vmem [thread:$0]  %s19_s25, 128, %s21_s29, [#allocation3]  }
   0x8   :  { %s445_s1 = smov [#allocation7]  }
   0x9   :  { %s45_s8 = sshll.u32 %s445_s1, 4  ;;  %s46_s8 = int_to_ptr.vmem [resolvable:$true] %s45_s8 }
   0xa   :  { %51 = dma.hbm_to_vmem [thread:$0]  %s44_s7, 1024, %s46_s8, [#allocation6], %s442_s26, %s442_s26, %s443_s27  }
   0xb   :  { %435 = dma.done.wait [#allocation3], 128  }
   0xc   :  { %436 = vsyncadd [#allocation3], 4294967168 }
   0xd   :  { %437 = dma.done.wait [#allocation6], 2048  }
   0xe   :  { %438 = vsyncadd [#allocation6], 4294965248  ;;  %v322_v0 = vld [vmem:[#allocation5 + $0x38] sm:$0xff]  ;;  %v321_v1 = vld [vmem:[#allocation5 + $0x30] sm:$0xff]  ;;  %s446_s11 = smov [#allocation8]   ;;  %s240_s15 = sshll.u32 %s500_s5, 4  ;;  %s241_s15 = int_to_ptr.hbm [resolvable:$true] %s240_s15 }
   0xf   :  { %136 = vmatpush.bf16.msra.mxu0 %v322_v0  ;;  %v330_v2 = vld [vmem:[#allocation7 + $0x38] sm:$0xff]  ;;  %v329_v3 = vld [vmem:[#allocation7 + $0x30] sm:$0xff]  ;;  %v320_v4 = vld [vmem:[#allocation5 + $0x28] sm:$0xff]  ;;  %s238_s12 = sshll.u32 %s446_s11, 4  ;;  %s239_s12 = int_to_ptr.vmem [resolvable:$true] %s238_s12 }
  0x10   :  { %219 = vmatpush.bf16.msra.mxu1 %v330_v2  ;;  %v328_v5 = vld [vmem:[#allocation7 + $0x28] sm:$0xff]  ;;  %v319_v6 = vld [vmem:[#allocation5 + $0x20] sm:$0xff]  ;;  %v318_v8 = vld [vmem:[#allocation5 + $0x18] sm:$0xff] }
  0x11   :  { %v327_v7 = vld [vmem:[#allocation7 + $0x20] sm:$0xff]  ;;  %v326_v9 = vld [vmem:[#allocation7 + $0x18] sm:$0xff]  ;;  %v317_v10 = vld [vmem:[#allocation5 + $0x10] sm:$0xff] }
  0x12   :  { %v325_v11 = vld [vmem:[#allocation7 + $0x10] sm:$0xff]  ;;  %v316_v12 = vld [vmem:[#allocation5 + $0x8] sm:$0xff]  ;;  %v315_v13 = vld [vmem:[#allocation5] sm:$0xff] }
  0x13   :  { %137 = vmatpush.bf16.msra.mxu0 %v321_v1  ;;  %v66_v14 = vld [vmem:[#allocation2] sm:$0xff]  ;;  %v324_v16 = vld [vmem:[#allocation7 + $0x8] sm:$0xff]  ;;  %v323_v17 = vld [vmem:[#allocation7] sm:$0xff] }
  0x14   :  { %220 = vmatpush.bf16.msra.mxu1 %v329_v3  ;;  %v67_v15 = vpack.c.bf16 %v66_v14, %v66_v14  ;;  %v337_v18 = vld [vmem:[%s497_s2] ss:$0 sm:$0xff] }
  0x15   :  { %v338_v24 = vld [vmem:[%s499_s4] ss:$0 sm:$0xff] }
  0x17   :  { %138 = vmatpush.bf16.msra.mxu0 %v320_v4 }
  0x18   :  { %221 = vmatpush.bf16.msra.mxu1 %v328_v5 }
  0x1b   :  { %139 = vmatpush.bf16.msra.mxu0 %v319_v6 }
  0x1c   :  { %222 = vmatpush.bf16.msra.mxu1 %v327_v7 }
  0x1f   :  { %140 = vmatpush.bf16.msra.mxu0 %v318_v8 }
  0x20   :  { %223 = vmatpush.bf16.msra.mxu1 %v326_v9 }
  0x23   :  { %141 = vmatpush.bf16.msra.mxu0 %v317_v10 }
  0x24   :  { %224 = vmatpush.bf16.msra.mxu1 %v325_v11 }
  0x27   :  { %142 = vmatpush.bf16.msra.mxu0 %v316_v12 }
  0x28   :  { %225 = vmatpush.bf16.msra.mxu1 %v324_v16 }
  0x2b   :  { %143 = vmatpush.bf16.msra.mxu0 %v315_v13 }
  0x2c   :  { %226 = vmatpush.bf16.msra.mxu1 %v323_v17 }
  0x2e   :  { %144 = vmatmul.bf16.vlgmr.msra.gmra.mxu0 %v67_v15 }
  0xab   :  { %v145_v19 = vpop.f32.mrf.mxu0 }
  0xac   :  { %v146_v20 = vadd.f32 %v337_v18, %v145_v19 }
  0xae   :  { %v149_v21 = vmax.f32 %v146_v20, 0.0 }
  0xb0   :  { %v150_v22 = vpack.c.bf16 %v149_v21, %v149_v21 }
  0xb2   :  { %227 = vmatmul.bf16.vlgmr.msra.gmra.mxu1 %v150_v22 }
  0xb3   :  { %v147_v23 = vpop.f32.mrf.mxu0 }
 0x12f   :  { %v228_v25 = vpop.f32.mrf.mxu1 }
 0x130   :  { %v229_v26 = vadd.f32 %v338_v24, %v228_v25 }
 0x132   :  { %232 = vst [vmem:[#allocation8] sm:$0xff] %v229_v26 }
 0x133   :  { %243 = dma.vmem_to_hbm [thread:$0]  %s239_s12, 128, %s241_s15, [#allocation4]  }
 0x137   :  { %v230_v27 = vpop.f32.mrf.mxu1 }
 0x138   :  { %439 = dma.done.wait [#allocation4], 128  }
 0x139   :  { %440 = vsyncadd [#allocation4], 4294967168 }
 0x13a   :  { %248 = vsyncpa [#allocation3], 1 }
 0x13b   :  { %249 = vsyncpa [#allocation6], 1 }
 0x13c   :  { %250 = vsyncpa [#allocation4], 1 }

</bundles_post_ra>
